<compile_context>
chip_gen: v6e
topology: v6e:2x2x1
jax: 0.10.0
libtpu: 0.0.40
codegen_flags: <defaults>
</compile_context>

<pallas_src>
import functools

import jax
import jax.numpy as jnp
import numpy as np
from jax.experimental import pallas as pl
from jax.experimental.pallas import tpu as pltpu

LEVEL = 256          # 2 ** 8 bits, symmetric=False, always_zero=False
LANE = 128
SUBLANE_BF16 = 16    # bf16 packs 16 rows per vreg sublane group


def _round_up(v, m):
    return ((v + m - 1) // m) * m


def _vmem_capacity_bytes():
    """Per-core VMEM capacity (generation aware), with a conservative fallback."""
    try:
        info = pltpu.get_tpu_info()
        cap = getattr(info, "vmem_capacity_bytes", None)
        if cap:
            return int(cap)
    except Exception:
        pass
    return 64 * 2 ** 20          # conservative: v7x per-TensorCore VMEM


# ---------------------------------------------------------------------------
# Quantization-parameter init (UniformAffineQuantizer._init_quantization_param
# with Scaler.MINMAX).  One-time parameter setup -> plain JAX glue.
# ---------------------------------------------------------------------------
def minmax_qparams(x, level=LEVEL):
    x_min = jnp.minimum(jnp.min(x), 0.0)
    x_max = jnp.maximum(jnp.max(x), 0.0)
    delta = (x_max - x_min) / (level - 1)
    delta = jnp.maximum(delta, 1e-8)
    zero_point = jnp.round(-x_min / delta)
    return delta, zero_point


def _fake_quant(x, delta, zero_point, level=LEVEL):
    # x_q  = clamp(round(x/delta) + zp, 0, level-1)   (ste_round == round in fwd)
    # x_dq = delta * (x_q - zp)
    x_q = jnp.clip(jnp.round(x / delta) + zero_point, 0.0, level - 1.0)
    return delta * (x_q - zero_point)


def _int_quant(x, delta, zero_point, level=LEVEL):
    """Zero-point-subtracted integer fake-quant values; |v| <= level-1 so the
    result is exactly representable in bf16 (LEVEL==256 -> 8 bit)."""
    return jnp.clip(jnp.round(x / delta) + zero_point, 0.0, level - 1.0) - zero_point


# ---------------------------------------------------------------------------
# Pallas kernels: quantized (integer-valued bf16) MXU matmul + per-channel
# scale & bias epilogue.  Quantization itself is hoisted to the wrapper.
# ---------------------------------------------------------------------------
def qmm_kernel_single_k(xq_ref, wq_ref, sb_ref, o_ref):
    # Whole K is resident: no accumulator scratch needed.
    acc = jnp.dot(xq_ref[...], wq_ref[...], preferred_element_type=jnp.float32)
    o_ref[...] = acc * sb_ref[0:1, :] + sb_ref[1:2, :]


def qmm_kernel_multi_k(xq_ref, wq_ref, sb_ref, o_ref, acc_ref):
    kk = pl.program_id(2)

    @pl.when(kk == 0)
    def _():
        acc_ref[...] = jnp.zeros_like(acc_ref)

    acc_ref[...] += jnp.dot(xq_ref[...], wq_ref[...],
                            preferred_element_type=jnp.float32)

    @pl.when(kk == pl.num_programs(2) - 1)
    def _():
        o_ref[...] = acc_ref[...] * sb_ref[0:1, :] + sb_ref[1:2, :]


# ---------------------------------------------------------------------------
# Glue: im2col (NCHW -> X_col) and the QuantLayer.forward wrapper
# ---------------------------------------------------------------------------
def im2col_nchw(x, kh, kw, stride, padding):
    n, c, h, w = x.shape
    xp = jnp.pad(x, ((0, 0), (0, 0), (padding, padding), (padding, padding)))
    ho = (h + 2 * padding - kh) // stride + 1
    wo = (w + 2 * padding - kw) // stride + 1
    cols = []
    for i in range(kh):
        for j in range(kw):
            cols.append(xp[:, :, i:i + ho * stride:stride, j:j + wo * stride:stride])
    patches = jnp.stack(cols, axis=2)                 # (N, C, KH*KW, Ho, Wo)
    patches = patches.transpose(0, 3, 4, 1, 2)        # (N, Ho, Wo, C, KH*KW)
    return patches.reshape(n * ho * wo, c * kh * kw), ho, wo


@functools.partial(jax.jit, static_argnames=("stride", "padding", "tm"))
def quant_layer_forward(x, w, b, *, stride=1, padding=1, tm=512):
    """QuantLayer.forward with use_wq=True, use_aq=True (Conv2d, MINMAX)."""
    n, cin, h, ww = x.shape
    cout, _, kh, kw = w.shape

    # --- quantizer init (aqtizer: channel_wise=False; wqtizer: channel_wise=True)
    da, za = minmax_qparams(x)
    w_flat = w.reshape(cout, -1)                                    # (Cout, K)
    dw, zw = jax.vmap(minmax_qparams)(w_flat)                       # (Cout,)

    # --- activation fake-quant folded into the im2col producer.  Done on the
    # small NCHW tensor (not the KH*KW-expanded slab); integer values are
    # exact in bf16 so the X_col slab is half the HBM traffic of f32.
    xq = _int_quant(x, da, za).astype(jnp.bfloat16)                 # NCHW bf16

    # --- weight fake-quant HOISTED out of the kernel (done once, not per tile)
    wq_c = _int_quant(w_flat, dw[:, None], zw[:, None])             # (Cout, K)
    wq_t = wq_c.T.astype(jnp.bfloat16)                              # (K, Cout)

    # --- conv as im2col matmul (bf16 integer X_col)
    x_col, ho, wo = im2col_nchw(xq, kh, kw, stride, padding)        # (M, K) bf16
    m, k = x_col.shape

    # ---- tiling (generation-aware) -----------------------------------------
    # N (Cout): lane-pad; resident single block up to 1024, else 256-wide tiles
    if cout <= 1024:
        cout_pad = _round_up(cout, LANE)
        tn = cout_pad
    else:
        cout_pad = _round_up(cout, 256)
        tn = 256
    grid_n = cout_pad // tn

    # K: single resident block (sublane-aligned) unless large, then 512-wide
    # K tiles + f32 accumulator scratch ("arbitrary" reduction axis).
    if k <= 2048:
        k_pad = _round_up(k, SUBLANE_BF16)
        tk = k_pad
    else:
        tk = 512
        k_pad = _round_up(k, tk)
    grid_k = k_pad // tk

    # M: big tiles for the mem-bound roofline, but keep >= 4 grid steps when M
    # allows (2 TCs on v7x x >= 2 pipeline steps); multiple of 16 (bf16 sublane).
    tm_eff = min(tm, _round_up(pl.cdiv(m, 4), SUBLANE_BF16))
    tm_eff = max(tm_eff, SUBLANE_BF16)

    # Shrink the M tile until the working set fits the per-core VMEM budget.
    vmem_cap = int(_vmem_capacity_bytes() * 0.75)   # ~96 MiB v5e/v6e, ~48 MiB v7x
    w_bufs = 2  # TODO(synk): pl.Buffered(1) on constant-index Wq/sb -> 1 (v7x headroom)

    def vmem_need(tm_):
        need = 2 * tm_ * tk * 2            # X tile, double-buffered, bf16
        need += w_bufs * tk * tn * 2       # weight tile(s), bf16
        need += 2 * 2 * tn * 4             # packed scale+bias
        need += 2 * tm_ * tn * 4           # output tile, double-buffered, f32
        if grid_k > 1:
            need += tm_ * tn * 4           # accumulator scratch
        return need

    while tm_eff > SUBLANE_BF16 and vmem_need(tm_eff) > vmem_cap:
        tm_eff = max(SUBLANE_BF16, _round_up(tm_eff // 2, SUBLANE_BF16))

    grid_m = pl.cdiv(m, tm_eff)
    m_pad = grid_m * tm_eff

    # ---- zero-pad operands (padded rows / K columns are exact zeros -> 0 dot
    # contribution; padded M rows & N columns are sliced off afterwards).
    if (m_pad, k_pad) != (m, k):
        x_col = jnp.zeros((m_pad, k_pad), jnp.bfloat16).at[:m, :k].set(x_col)
    wq_pad = jnp.zeros((k_pad, cout_pad), jnp.bfloat16).at[:k, :cout].set(wq_t)
    sb = jnp.zeros((2, cout_pad), jnp.float32)
    sb = sb.at[0, :cout].set((da * dw).astype(jnp.float32))         # per-chan scale
    sb = sb.at[1, :cout].set(b.astype(jnp.float32))                 # bias

    vmem_limit = int(min(vmem_cap,
                         max(32 * 2 ** 20, vmem_need(tm_eff) + 8 * 2 ** 20)))

    if grid_k == 1:
        kernel = qmm_kernel_single_k
        scratch_shapes = ()
    else:
        kernel = qmm_kernel_multi_k
        scratch_shapes = [pltpu.VMEM((tm_eff, tn), jnp.float32)]

    y_flat = pl.pallas_call(
        kernel,
        out_shape=jax.ShapeDtypeStruct((m_pad, cout_pad), jnp.float32),
        grid=(grid_m, grid_n, grid_k),
        in_specs=[
            pl.BlockSpec((tm_eff, tk), lambda i, j, kk: (i, kk)),   # Xq (bf16 ints)
            pl.BlockSpec((tk, tn), lambda i, j, kk: (kk, j)),       # Wq (bf16 ints)
            pl.BlockSpec((2, tn), lambda i, j, kk: (0, j)),         # [da*dw ; bias]
        ],
        out_specs=pl.BlockSpec((tm_eff, tn), lambda i, j, kk: (i, j)),
        scratch_shapes=scratch_shapes,
        compiler_params=pltpu.CompilerParams(
            dimension_semantics=("parallel", "parallel", "arbitrary"),
            vmem_limit_bytes=vmem_limit),
    )(x_col, wq_pad, sb)

    # strip padding: (M, Cout) -> (N, Ho, Wo, Cout) -> NCHW
    return y_flat[:m, :cout].reshape(n, ho, wo, cout).transpose(0, 3, 1, 2)


# ---------------------------------------------------------------------------
# Pure-JAX reference (mirrors the PyTorch semantics) for a correctness check
# ---------------------------------------------------------------------------
def reference_forward(x, w, b, *, stride=1, padding=1):
    da, za = minmax_qparams(x)
    cout = w.shape[0]
    dw, zw = jax.vmap(minmax_qparams)(w.reshape(cout, -1))
    x_dq = _fake_quant(x, da, za)
    w_dq = _fake_quant(w, dw.reshape(-1, 1, 1, 1), zw.reshape(-1, 1, 1, 1))
    y = jax.lax.conv_general_dilated(
        x_dq, w_dq,
        window_strides=(stride, stride),
        padding=((padding, padding), (padding, padding)),
        dimension_numbers=("NCHW", "OIHW", "NCHW"),
    )
    return y + b.reshape(1, -1, 1, 1)


if __name__ == "__main__":
    key = jax.random.PRNGKey(0)
    kx, kw_, kb = jax.random.split(key, 3)

    # QuantLayer wrapping nn.Conv2d(4, 8, kernel_size=3, padding=1, bias=True)
    N, CIN, H, W = 2, 4, 16, 16
    COUT, KH, KW = 8, 3, 3

    x = jax.random.normal(kx, (N, CIN, H, W), dtype=jnp.float32)
    w = jax.random.normal(kw_, (COUT, CIN, KH, KW), dtype=jnp.float32) * 0.1
    b = jax.random.normal(kb, (COUT,), dtype=jnp.float32) * 0.1

    y = quant_layer_forward(x, w, b, stride=1, padding=1)
    y = jax.block_until_ready(y)

    y_ref = jax.block_until_ready(reference_forward(x, w, b, stride=1, padding=1))

    assert y.shape == (N, COUT, H, W), y.shape
    np.testing.assert_allclose(np.asarray(y), np.asarray(y_ref), rtol=1e-4, atol=1e-4)

    print("KERNEL_OK")
</pallas_src>

<mosaic_0001>
module attributes {stable_mosaic.version = 11 : i64} {
  func.func @qmm_kernel_single_k(%arg0: i32, %arg1: i32, %arg2: i32, %arg3: memref<128x48xbf16, #tpu.memory_space<vmem>>, %arg4: memref<48x128xbf16, #tpu.memory_space<vmem>>, %arg5: memref<2x128xf32, #tpu.memory_space<vmem>>, %arg6: memref<128x128xf32, #tpu.memory_space<vmem>>) attributes {dimension_semantics = [#tpu.dimension_semantics<parallel>, #tpu.dimension_semantics<parallel>, #tpu.dimension_semantics<arbitrary>], iteration_bounds = array<i64: 4, 1, 1>, scalar_prefetch = 0 : i64, scratch_operands = 0 : i64, tpu.core_type = #tpu.core_type<tc>, window_params = [{transform_indices = @transform_0, window_bounds = array<i64: 128, 48>}, {transform_indices = @transform_1, window_bounds = array<i64: 48, 128>}, {transform_indices = @transform_2, window_bounds = array<i64: 2, 128>}, {transform_indices = @transform_3, window_bounds = array<i64: 128, 128>}]} {
    %c0 = arith.constant 0 : index
    %c0_0 = arith.constant 0 : index
    %0 = vector.load %arg3[%c0, %c0_0] : memref<128x48xbf16, #tpu.memory_space<vmem>>, vector<128x48xbf16>
    %c0_1 = arith.constant 0 : index
    %c0_2 = arith.constant 0 : index
    %1 = vector.load %arg4[%c0_1, %c0_2] : memref<48x128xbf16, #tpu.memory_space<vmem>>, vector<48x128xbf16>
    %cst = arith.constant dense<0.000000e+00> : vector<128x128xf32>
    %2 = tpu.matmul %0, %1, %cst {dimension_numbers = #tpu.dot_dimension_numbers<[1], [0], [0], [1], [0, 0, 1, 1], [], []>} : vector<128x48xbf16>, vector<48x128xbf16>, vector<128x128xf32> -> vector<128x128xf32>
    %c0_3 = arith.constant 0 : index
    %c0_4 = arith.constant 0 : index
    %3 = vector.load %arg5[%c0_3, %c0_4] : memref<2x128xf32, #tpu.memory_space<vmem>>, vector<1x128xf32>
    %4 = vector.broadcast %3 : vector<1x128xf32> to vector<128x128xf32>
    %5 = arith.mulf %2, %4 : vector<128x128xf32>
    %c1 = arith.constant 1 : index
    %c0_5 = arith.constant 0 : index
    %6 = vector.load %arg5[%c1, %c0_5] : memref<2x128xf32, #tpu.memory_space<vmem>>, vector<1x128xf32>
    %7 = vector.broadcast %6 : vector<1x128xf32> to vector<128x128xf32>
    %8 = arith.addf %5, %7 : vector<128x128xf32>
    %c0_6 = arith.constant 0 : index
    %c0_7 = arith.constant 0 : index
    %9 = vector.load %arg6[%c0_6, %c0_7] : memref<128x128xf32, #tpu.memory_space<vmem>>, vector<128x128xf32>
    tpu.vector_store %arg6[%c0_6, %c0_7], %8 {strides = array<i32>} : memref<128x128xf32, #tpu.memory_space<vmem>>, vector<128x128xf32>,
    return
  }
  func.func @transform_0(%arg0: i32, %arg1: i32, %arg2: i32) -> (i32, i32) {
    %c0_i32 = arith.constant 0 : i32
    return %arg0, %arg2 : i32, i32
  }
  func.func @transform_1(%arg0: i32, %arg1: i32, %arg2: i32) -> (i32, i32) {
    %c0_i32 = arith.constant 0 : i32
    return %arg2, %arg1 : i32, i32
  }
  func.func @transform_2(%arg0: i32, %arg1: i32, %arg2: i32) -> (i32, i32) {
    %c0_i32 = arith.constant 0 : i32
    %c0_i32_0 = arith.constant 0 : i32
    return %c0_i32, %arg1 : i32, i32
  }
  func.func @transform_3(%arg0: i32, %arg1: i32, %arg2: i32) -> (i32, i32) {
    %c0_i32 = arith.constant 0 : i32
    return %arg0, %arg1 : i32, i32
  }
}

</mosaic_0001>

<bundles_post_ra>
// kernel: quant_layer_forward.1
= control target key start
LH: loop header
LB: loop body
LE: loop exit
PB: predicated region body
PF: predicated region fallthrough
CT: control target
= control target key end

     0   :  { %s789_s12 = smov 0   ;;  %s791_s13 = smov 0   ;;  %s867_s0 = inlined_call_operand.vmem [shape: bf16[512,48], index: 0, kind: input, shape index: {}]   ;;  %s868_s1 = inlined_call_operand.vmem [shape: bf16[48,128], index: 1, kind: input, shape index: {}]   ;;  %s869_s2 = inlined_call_operand.vmem [shape: f32[2,128], index: 2, kind: input, shape index: {}]   ;;  %s870_s3 = inlined_call_operand.vmem [shape: f32[512,128], index: 3, kind: output, shape index: {}]  }
   0x1   :  { %s793_s14 = smov 0  }
   0x2 LB: > { %s32_s15 = sadd.s32 1, %s763_s13  ;;  %p643_p0 = scmp.ge.s32.totalorder %s767_s14, 1  ;;  %s767_s14 = sphi %s793_s14, %s13_s14   ;;  %s763_s13 = sphi %s791_s13, %s872_s13   ;;  %s759_s12 = sphi %s789_s12, %s871_s12  }
   0x3   : > { %p34_p1 = scmp.ge.s32.totalorder %s32_s15, 4  ;;  %p189_p2 = scmp.lt.s32.totalorder %s767_s14, 5 }
   0x5   : > { %s874_s15 = smov (%p34_p1, %s32_s15), 0  ;;  %p190_p3 = pnand %p643_p0, %p189_p2 }
   0x6   : > { %s644_s18 = sshll.u32 (!%p190_p3), %s759_s12, 4 }
   0x7   : > { %193 = sbr.rel (%p190_p3) target bundleno = 237 (0xed), region = 32  ;;  %p232_p4 = scmp.lt.s32.totalorder (!%p190_p3), %s644_s18, 63 }
   0xc   : > { %v734_v0 = vld [vmem:[%s868_s1 + $0x10] sm:$0xff]   ;;  %v735_v1 = vld [vmem:[%s868_s1 + $0x8] sm:$0xff]   ;;  %s876_s18 = smov (!%p232_p4, %s644_s18), 63  ;;  %v736_v2 = vld [vmem:[%s868_s1] sm:$0xff]   ;;  %vm343_vm0 = vcmask 392192  }
   0xd   : > { %682 = vmatprep.subr.bf16.mxu0 %v734_v0  ;;  %704 = vmatprep.subr.bf16.mxu1 %v734_v0  ;;  %s645_s23 = sshll.u32 %s876_s18, 2  ;;  %v667_v11 = vld [vmem:[%s869_s2] ss:$0 sm:$0xff]  ;;  %s647_s29 = sshll.u32 %s876_s18, 3  ;;  %v668_v13 = vld [vmem:[%s869_s2 + $0x1] ss:$0 sm:$0xff] }
   0xe   : > { %683 = vmatpush3.bf16.msra.mxu0 %v734_v0  ;;  %707 = vmatpush3.bf16.msra.mxu1 %v734_v0  ;;  %s238_s26 = scalar_lea.vmem %s867_s0, %s645_s23  ;;  %s840_s7 = scalar_lea.vmem %s870_s3, %s647_s29 }
   0xf   : > { %684 = vmatprep.subr.bf16.mxu0 %v735_v1  ;;  %705 = vmatprep.subr.bf16.mxu1 %v735_v1  ;;  %v737_v3 = vld [vmem:[%s238_s26] sm:$0xff]   ;;  %v739_v5 = vld [vmem:[%s238_s26 + $0x8] sm:$0xff]   ;;  %v741_v7 = vld [vmem:[%s238_s26 + $0x10] sm:$0xff]  }
  0x10   : > { %v738_v4 = vld [vmem:[%s238_s26 + $0x20] sm:$0xff]   ;;  %688 = vmatprep.mubr.msk.bf16.mxu0 %vm343_vm0, %v737_v3  ;;  %v740_v6 = vld [vmem:[%s238_s26 + $0x28] sm:$0xff]   ;;  %v742_v8 = vld [vmem:[%s238_s26 + $0x30] sm:$0xff]  }
  0x11   : > { %696 = vmatprep.mubr.msk.bf16.mxu1 %vm343_vm0, %v738_v4  ;;  %v743_v9 = vld [vmem:[%s238_s26 + $0x18] sm:$0xff]  }
  0x12   : > { %685 = vmatpush3.bf16.msra.mxu0 %v735_v1  ;;  %708 = vmatpush3.bf16.msra.mxu1 %v735_v1  ;;  %v744_v10 = vld [vmem:[%s238_s26 + $0x38] sm:$0xff]  }
  0x13   : > { %686 = vmatprep.subr.bf16.mxu0 %v736_v2  ;;  %706 = vmatprep.subr.bf16.mxu1 %v736_v2 }
  0x16   : > { %687 = vmatpush3.bf16.msra.mxu0 %v736_v2  ;;  %709 = vmatpush3.bf16.msra.mxu1 %v736_v2 }
  0x19   : > { %689 = vmatmul.mubr.msk.bf16.vlgmr.msra.gmra.mxu0 %vm343_vm0, %v739_v5  ;;  %697 = vmatmul.mubr.msk.bf16.vlgmr.msra.gmra.mxu1 %vm343_vm0, %v740_v6 }
  0x1a   : > { %692 = vmatprep.mubr.msk.bf16.mxu0 %vm343_vm0, %v741_v7  ;;  %700 = vmatprep.mubr.msk.bf16.mxu1 %vm343_vm0, %v742_v8 }
  0x21   : > { %693 = vmatmul.mubr.msk.bf16.gmra.mxu0 %vm343_vm0, %v743_v9  ;;  %701 = vmatmul.mubr.msk.bf16.gmra.mxu1 %vm343_vm0, %v744_v10 }
  0xd9   : > { %v690_v12 = vpop.f32.mrf.mxu0  ;;  %v698_v14 = vpop.f32.mrf.mxu1 }
  0xda   : > { %v472_v15 = vmul.f32 %v690_v12, %v667_v11  ;;  %v480_v16 = vmul.f32 %v698_v14, %v667_v11 }
  0xdb   : > { %v402_v17 = vpop.f32.mrf.mxu0  ;;  %v434_v18 = vpop.f32.mrf.mxu1 }
  0xdc   : > { %v493_v19 = vadd.f32 %v668_v13, %v472_v15  ;;  %v501_v20 = vadd.f32 %v668_v13, %v480_v16  ;;  %v470_v21 = vmul.f32 %v667_v11, %v402_v17  ;;  %v478_v22 = vmul.f32 %v667_v11, %v434_v18 }
  0xdd   : > { %v691_v23 = vpop.f32.mrf.mxu0  ;;  %v699_v24 = vpop.f32.mrf.mxu1 }
  0xde   : > { %509 = vst [vmem:[%s840_s7 + $0x10] sm:$0xff] %v493_v19  ;;  %517 = vst [vmem:[%s840_s7 + $0x50] sm:$0xff] %v501_v20  ;;  %v491_v25 = vadd.f32 %v668_v13, %v470_v21  ;;  %v499_v26 = vadd.f32 %v668_v13, %v478_v22  ;;  %v473_v27 = vmul.f32 %v691_v23, %v667_v11 }
  0xdf   : > { %v481_v28 = vmul.f32 %v699_v24, %v667_v11  ;;  %v405_v29 = vpop.f32.mrf.mxu0  ;;  %v437_v30 = vpop.f32.mrf.mxu1 }
  0xe0   : > { %507 = vst [vmem:[%s840_s7] sm:$0xff] %v491_v25  ;;  %515 = vst [vmem:[%s840_s7 + $0x40] sm:$0xff] %v499_v26  ;;  %v494_v31 = vadd.f32 %v668_v13, %v473_v27  ;;  %v471_v33 = vmul.f32 %v667_v11, %v405_v29  ;;  %v479_v34 = vmul.f32 %v667_v11, %v437_v30 }
  0xe1   : > { %v502_v32 = vadd.f32 %v668_v13, %v481_v28  ;;  %v694_v35 = vpop.f32.mrf.mxu0  ;;  %v702_v36 = vpop.f32.mrf.mxu1 }
  0xe2   : > { %510 = vst [vmem:[%s840_s7 + $0x18] sm:$0xff] %v494_v31  ;;  %v492_v37 = vadd.f32 %v668_v13, %v471_v33  ;;  %v500_v38 = vadd.f32 %v668_v13, %v479_v34  ;;  %v476_v39 = vmul.f32 %v694_v35, %v667_v11  ;;  %v484_v40 = vmul.f32 %v702_v36, %v667_v11 }
  0xe3   : > { %518 = vst [vmem:[%s840_s7 + $0x58] sm:$0xff] %v502_v32  ;;  %v418_v41 = vpop.f32.mrf.mxu0  ;;  %v450_v42 = vpop.f32.mrf.mxu1 }
  0xe4   : > { %508 = vst [vmem:[%s840_s7 + $0x8] sm:$0xff] %v492_v37  ;;  %516 = vst [vmem:[%s840_s7 + $0x48] sm:$0xff] %v500_v38  ;;  %v497_v43 = vadd.f32 %v668_v13, %v476_v39  ;;  %v505_v44 = vadd.f32 %v668_v13, %v484_v40  ;;  %v474_v45 = vmul.f32 %v667_v11, %v418_v41 }
  0xe5   : > { %v482_v46 = vmul.f32 %v667_v11, %v450_v42  ;;  %v695_v47 = vpop.f32.mrf.mxu0  ;;  %v703_v48 = vpop.f32.mrf.mxu1 }
  0xe6   : > { %513 = vst [vmem:[%s840_s7 + $0x30] sm:$0xff] %v497_v43  ;;  %521 = vst [vmem:[%s840_s7 + $0x70] sm:$0xff] %v505_v44  ;;  %v495_v49 = vadd.f32 %v668_v13, %v474_v45  ;;  %v477_v51 = vmul.f32 %v695_v47, %v667_v11  ;;  %v485_v52 = vmul.f32 %v703_v48, %v667_v11 }
  0xe7   : > { %v503_v50 = vadd.f32 %v668_v13, %v482_v46  ;;  %v421_v53 = vpop.f32.mrf.mxu0  ;;  %v453_v54 = vpop.f32.mrf.mxu1 }
  0xe8   : > { %511 = vst [vmem:[%s840_s7 + $0x20] sm:$0xff] %v495_v49  ;;  %v498_v55 = vadd.f32 %v668_v13, %v477_v51  ;;  %v506_v56 = vadd.f32 %v668_v13, %v485_v52  ;;  %v475_v57 = vmul.f32 %v667_v11, %v421_v53  ;;  %v483_v58 = vmul.f32 %v667_v11, %v453_v54 }
  0xe9   : > { %519 = vst [vmem:[%s840_s7 + $0x60] sm:$0xff] %v503_v50 }
  0xea   : > { %514 = vst [vmem:[%s840_s7 + $0x38] sm:$0xff] %v498_v55  ;;  %522 = vst [vmem:[%s840_s7 + $0x78] sm:$0xff] %v506_v56  ;;  %v496_v59 = vadd.f32 %v668_v13, %v475_v57  ;;  %v504_v60 = vadd.f32 %v668_v13, %v483_v58 }
  0xec   : > { %512 = vst [vmem:[%s840_s7 + $0x28] sm:$0xff] %v496_v59  ;;  %520 = vst [vmem:[%s840_s7 + $0x68] sm:$0xff] %v504_v60 }
  0xed PF: > { %s13_s14 = sadd.s32 1, %s767_s14   ;;  %s871_s12 = smov %s763_s13 }
  0xee   : > { %p10_p5 = scmp.ge.s32.totalorder %s13_s14, 6   ;;  %s872_s13 = smov %s874_s15 }
  0xf0   :  { %12 = sbr.rel (!%p10_p5) target bundleno = 2 (0x2), region = 68 }

</bundles_post_ra>
